<compile_context>
chip_gen: v7x
topology: tpu7x:2x2x1
jax: 0.10.0
libtpu: 0.0.40
codegen_flags: <defaults>
</compile_context>

<pallas_src>
import functools

import jax
import jax.numpy as jnp
from jax.experimental import pallas as pl
from jax.experimental.pallas import tpu as pltpu


def _qat_ternary_linear_kernel(alpha_ref, x_ref, qt_ref, bias_ref, o_ref, acc_ref):
    """One (tm, tn) output tile; K is the innermost (reduction) grid axis."""
    k = pl.program_id(2)

    @pl.when(k == 0)
    def _init():
        acc_ref[...] = jnp.zeros_like(acc_ref)

    # Ternary codes are exact {-1, 0, 1} stored in bf16; cast up so the
    # activation path stays in f32 (bit-close to the reference).  Weight is
    # already (K, N): the MXU consumes it directly, no in-kernel transpose.
    q = qt_ref[...].astype(jnp.float32)
    acc_ref[...] += jnp.dot(x_ref[...], q, preferred_element_type=jnp.float32)

    @pl.when(k == pl.num_programs(2) - 1)
    def _finalize():
        alpha = alpha_ref[0, 0]                      # per-tensor scale (SMEM scalar)
        out = acc_ref[...] * alpha + bias_ref[...]   # bias_ref is (1, tn), broadcasts
        o_ref[...] = out.astype(o_ref.dtype)


def _round_up(v, m):
    return (v + m - 1) // m * m


@functools.partial(jax.jit, static_argnames=("tm", "tn", "tk"))
def qat_ternary_linear(x, weight, bias=None, *, tm=256, tn=256, tk=512):
    """x: (M, K) f32, weight: (N, K) f32, bias: (N,) f32 or None -> (M, N) f32."""
    M, K = x.shape
    N, K2 = weight.shape
    assert K == K2, (x.shape, weight.shape)

    # ---- Weight quantization, hoisted out of the kernel (done once) ----------
    alpha = jnp.mean(jnp.abs(weight))
    q = jnp.clip(jnp.round(weight / alpha), -1.0, 1.0)   # {-1, 0, 1}
    q_t = q.T.astype(jnp.bfloat16)                       # (K, N), exact in bf16

    if bias is None:
        bias = jnp.zeros((N,), dtype=x.dtype)

    # ---- Tile sizes (clamped for small shapes) + zero padding to multiples ---
    tm = min(tm, _round_up(M, 8))      # sublane-aligned
    tk = min(tk, _round_up(K, 128))    # lane-aligned
    tn = min(tn, _round_up(N, 128))    # lane-dense output
    Mp, Kp, Np = _round_up(M, tm), _round_up(K, tk), _round_up(N, tn)

    x_p = jnp.pad(x, ((0, Mp - M), (0, Kp - K)))
    q_p = jnp.pad(q_t, ((0, Kp - K), (0, Np - N)))
    b_p = jnp.pad(bias, (0, Np - N)).reshape(1, Np).astype(jnp.float32)
    alpha_arr = jnp.reshape(alpha, (1, 1)).astype(jnp.float32)

    grid = (Mp // tm, Np // tn, Kp // tk)

    out = pl.pallas_call(
        _qat_ternary_linear_kernel,
        out_shape=jax.ShapeDtypeStruct((Mp, Np), x.dtype),
        grid_spec=pltpu.PrefetchScalarGridSpec(
            num_scalar_prefetch=0,
            grid=grid,
            in_specs=[
                # per-tensor scale: tiny scalar, lives in SMEM
                pl.BlockSpec(memory_space=pltpu.MemorySpace.SMEM),
                # activations: (tm, tk) tile, reused across the N axis
                pl.BlockSpec((tm, tk), lambda i, j, k: (i, k)),
                # pre-transposed ternary weight: (tk, tn) tile, reused across M
                pl.BlockSpec((tk, tn), lambda i, j, k: (k, j)),
                # bias row: (1, tn)
                pl.BlockSpec((1, tn), lambda i, j, k: (0, j)),
            ],
            out_specs=pl.BlockSpec((tm, tn), lambda i, j, k: (i, j)),
            scratch_shapes=[pltpu.VMEM((tm, tn), jnp.float32)],
        ),
        compiler_params=pltpu.CompilerParams(
            dimension_semantics=("parallel", "parallel", "arbitrary"),
        ),
        cost_estimate=pl.CostEstimate(
            flops=2 * Mp * Np * Kp,
            transcendentals=0,
            bytes_accessed=x_p.size * 4 + q_p.size * 2 + Mp * Np * 4,
        ),
    )(alpha_arr, x_p, q_p, b_p)

    return out[:M, :N]


def qat_ternary_linear_reference(x, weight, bias=None):
    """Pure-JAX mirror of the PyTorch forward."""
    alpha = jnp.mean(jnp.abs(weight))
    q = jnp.clip(jnp.round(weight / alpha), -1.0, 1.0)
    w_q = alpha * q
    out = x @ w_q.T
    if bias is not None:
        out = out + bias
    return out


if __name__ == "__main__":
    # Small, forward-consistent shapes: batch=8, in_features=64, out_features=32.
    batch, in_features, out_features = 8, 64, 32

    key = jax.random.PRNGKey(0)
    kx, kw, kb = jax.random.split(key, 3)

    x = jax.random.normal(kx, (batch, in_features), dtype=jnp.float32)
    # ~ kaiming_uniform(a=sqrt(5)): uniform in [-1/sqrt(fan_in), 1/sqrt(fan_in)]
    bound = 1.0 / (in_features ** 0.5)
    weight = jax.random.uniform(
        kw, (out_features, in_features), minval=-bound, maxval=bound,
        dtype=jnp.float32)
    bias = jax.random.uniform(
        kb, (out_features,), minval=-bound, maxval=bound, dtype=jnp.float32)

    out = qat_ternary_linear(x, weight, bias)
    out = jax.block_until_ready(out)

    ref = qat_ternary_linear_reference(x, weight, bias)
    assert out.shape == (batch, out_features)
    assert jnp.allclose(out, ref, atol=1e-4, rtol=1e-4), (
        float(jnp.max(jnp.abs(out - ref))))

    print("KERNEL_OK")
</pallas_src>

<mosaic_0001>
module attributes {stable_mosaic.version = 11 : i64} {
  func.func @_qat_ternary_linear_kernel(%arg0: i32, %arg1: i32, %arg2: i32, %arg3: memref<1x1xf32, #tpu.memory_space<smem>>, %arg4: memref<8x128xf32, #tpu.memory_space<vmem>>, %arg5: memref<128x128xbf16, #tpu.memory_space<vmem>>, %arg6: memref<1x128xf32, #tpu.memory_space<vmem>>, %arg7: memref<8x128xf32, #tpu.memory_space<vmem>>, %arg8: memref<8x128xf32, #tpu.memory_space<vmem>>) attributes {dimension_semantics = [#tpu.dimension_semantics<parallel>, #tpu.dimension_semantics<parallel>, #tpu.dimension_semantics<arbitrary>], iteration_bounds = array<i64: 1, 1, 1>, scalar_prefetch = 0 : i64, scratch_operands = 1 : i64, tpu.core_type = #tpu.core_type<tc>, window_params = [{transform_indices = @transform_0, window_bounds = array<i64: 1, 1>}, {transform_indices = @transform_1, window_bounds = array<i64: 8, 128>}, {transform_indices = @transform_2, window_bounds = array<i64: 128, 128>}, {transform_indices = @transform_3, window_bounds = array<i64: 1, 128>}, {transform_indices = @transform_4, window_bounds = array<i64: 8, 128>}]} {
    %c0_i32 = arith.constant 0 : i32
    %0 = arith.cmpi eq, %arg2, %c0_i32 : i32
    %1 = arith.extui %0 : i1 to i32
    %c0_i32_0 = arith.constant 0 : i32
    %2 = arith.cmpi ne, %1, %c0_i32_0 : i32
    scf.if %2 {
      %cst_10 = arith.constant 0.000000e+00 : f32
      %13 = vector.broadcast %cst_10 : f32 to vector<8x128xf32>
      %c0_11 = arith.constant 0 : index
      %c0_12 = arith.constant 0 : index
      %14 = vector.load %arg8[%c0_11, %c0_12] : memref<8x128xf32, #tpu.memory_space<vmem>>, vector<8x128xf32>
      tpu.vector_store %arg8[%c0_11, %c0_12], %13 {strides = array<i32>} : memref<8x128xf32, #tpu.memory_space<vmem>>, vector<8x128xf32>,
    } else {
    }
    %c0 = arith.constant 0 : index
    %c0_1 = arith.constant 0 : index
    %3 = vector.load %arg5[%c0, %c0_1] : memref<128x128xbf16, #tpu.memory_space<vmem>>, vector<128x128xbf16>
    %4 = arith.extf %3 : vector<128x128xbf16> to vector<128x128xf32>
    %c0_2 = arith.constant 0 : index
    %c0_3 = arith.constant 0 : index
    %5 = vector.load %arg8[%c0_2, %c0_3] : memref<8x128xf32, #tpu.memory_space<vmem>>, vector<8x128xf32>
    %c0_4 = arith.constant 0 : index
    %c0_5 = arith.constant 0 : index
    %6 = vector.load %arg4[%c0_4, %c0_5] : memref<8x128xf32, #tpu.memory_space<vmem>>, vector<8x128xf32>
    %cst = arith.constant dense<0.000000e+00> : vector<8x128xf32>
    %7 = tpu.matmul %6, %4, %cst {dimension_numbers = #tpu.dot_dimension_numbers<[1], [0], [0], [1], [0, 0, 1, 1], [], []>} : vector<8x128xf32>, vector<128x128xf32>, vector<8x128xf32> -> vector<8x128xf32>
    %8 = arith.addf %5, %7 : vector<8x128xf32>
    %c0_6 = arith.constant 0 : index
    %c0_7 = arith.constant 0 : index
    %9 = vector.load %arg8[%c0_6, %c0_7] : memref<8x128xf32, #tpu.memory_space<vmem>>, vector<8x128xf32>
    tpu.vector_store %arg8[%c0_6, %c0_7], %8 {strides = array<i32>} : memref<8x128xf32, #tpu.memory_space<vmem>>, vector<8x128xf32>,
    %c0_i32_8 = arith.constant 0 : i32
    %10 = arith.cmpi eq, %arg2, %c0_i32_8 : i32
    %11 = arith.extui %10 : i1 to i32
    %c0_i32_9 = arith.constant 0 : i32
    %12 = arith.cmpi ne, %11, %c0_i32_9 : i32
    scf.if %12 {
      %c0_10 = arith.constant 0 : index
      %c0_11 = arith.constant 0 : index
      %13 = memref.load %arg3[%c0_10, %c0_11] : memref<1x1xf32, #tpu.memory_space<smem>>
      %c0_12 = arith.constant 0 : index
      %c0_13 = arith.constant 0 : index
      %14 = vector.load %arg8[%c0_12, %c0_13] : memref<8x128xf32, #tpu.memory_space<vmem>>, vector<8x128xf32>
      %15 = vector.broadcast %13 : f32 to vector<8x128xf32>
      %16 = arith.mulf %14, %15 : vector<8x128xf32>
      %c0_14 = arith.constant 0 : index
      %c0_15 = arith.constant 0 : index
      %17 = vector.load %arg6[%c0_14, %c0_15] : memref<1x128xf32, #tpu.memory_space<vmem>>, vector<1x128xf32>
      %18 = vector.broadcast %17 : vector<1x128xf32> to vector<8x128xf32>
      %19 = arith.addf %16, %18 : vector<8x128xf32>
      %c0_16 = arith.constant 0 : index
      %c0_17 = arith.constant 0 : index
      %20 = vector.load %arg7[%c0_16, %c0_17] : memref<8x128xf32, #tpu.memory_space<vmem>>, vector<8x128xf32>
      tpu.vector_store %arg7[%c0_16, %c0_17], %19 {strides = array<i32>} : memref<8x128xf32, #tpu.memory_space<vmem>>, vector<8x128xf32>,
    } else {
    }
    return
  }
  func.func @transform_0(%arg0: i32, %arg1: i32, %arg2: i32) -> (i32, i32) {
    %c0_i32 = arith.constant 0 : i32
    %c0_i32_0 = arith.constant 0 : i32
    %c0_i32_1 = arith.constant 0 : i32
    return %c0_i32, %c0_i32_0 : i32, i32
  }
  func.func @transform_1(%arg0: i32, %arg1: i32, %arg2: i32) -> (i32, i32) {
    %c0_i32 = arith.constant 0 : i32
    return %arg0, %arg2 : i32, i32
  }
  func.func @transform_2(%arg0: i32, %arg1: i32, %arg2: i32) -> (i32, i32) {
    %c0_i32 = arith.constant 0 : i32
    return %arg2, %arg1 : i32, i32
  }
  func.func @transform_3(%arg0: i32, %arg1: i32, %arg2: i32) -> (i32, i32) {
    %c0_i32 = arith.constant 0 : i32
    %c0_i32_0 = arith.constant 0 : i32
    return %c0_i32, %arg1 : i32, i32
  }
  func.func @transform_4(%arg0: i32, %arg1: i32, %arg2: i32) -> (i32, i32) {
    %c0_i32 = arith.constant 0 : i32
    return %arg0, %arg1 : i32, i32
  }
}

</mosaic_0001>

<bundles_post_ra>
// kernel: qat_ternary_linear.1
= control target key start
LH: loop header
LB: loop body
LE: loop exit
PB: predicated region body
PF: predicated region fallthrough
CT: control target
= control target key end

     0   :  { %v304_v1 = vmov 0.0|0.0   ;;  %vm305_vm0 = vmmov 0   ;;  %v306_v2 = vmov 0.0   ;;  %s378_s0 = inlined_call_operand.<no memory space> [shape: f32[1,1], index: 0, kind: input, shape index: {}]   ;;  %s379_s1 = inlined_call_operand.vmem [shape: f32[8,128], index: 1, kind: input, shape index: {}]   ;;  %s380_s2 = inlined_call_operand.vmem [shape: bf16[128,128], index: 2, kind: input, shape index: {}]   ;;  %s381_s3 = inlined_call_operand.vmem [shape: f32[1,128], index: 3, kind: input, shape index: {}]   ;;  %s382_s4 = inlined_call_operand.hbm [shape: f32[8,128], index: 4, kind: output, shape index: {}]  }
   0x1   :  { %v162_v0 = vld [vmem:[%s380_s2] sm:$0xff]   ;;  %252 = vmatprep.subr.bf16.mxu0 %v304_v1  ;;  %249 = vmatprep.mubr.msk.f32.mxu0 %vm305_vm0, %v306_v2  ;;  %v193_v3 = vld [vmem:[%s380_s2 + $0x8] sm:$0xff]  }
   0x2   :  { %254 = vmatpush3.bf16.msra.mxu0 %v162_v0 }
   0x3   :  { %255 = vmatprep.subr.bf16.mxu0 %v304_v1 }
   0x4   :  { %10 = vsyncpa [#allocation5], 0  ;;  %v194_v4 = vld [vmem:[%s380_s2 + $0x10] sm:$0xff]   ;;  %v195_v5 = vld [vmem:[%s380_s2 + $0x18] sm:$0xff]   ;;  %v135_v11 = vstv %s378_s0  ;;  %s307_s11 = smov [#allocation4]  }
   0x5   :  { %v196_v6 = vld [vmem:[%s380_s2 + $0x20] sm:$0xff]   ;;  %v197_v7 = vld [vmem:[%s380_s2 + $0x28] sm:$0xff]   ;;  %v198_v8 = vld [vmem:[%s380_s2 + $0x30] sm:$0xff]   ;;  %s152_s12 = sshll.u32 %s307_s11, 4  ;;  %s153_s12 = int_to_ptr.vmem [resolvable:$true] %s152_s12 }
   0x6   :  { %257 = vmatpush3.bf16.msra.mxu0 %v193_v3  ;;  %v199_v9 = vld [vmem:[%s380_s2 + $0x38] sm:$0xff]   ;;  %v57_v10 = vld [vmem:[%s379_s1] sm:$0xff]  ;;  %s280_s2 = scalar_lea.vmem %s153_s12, 128  ;;  %p285_p1 = scmp.lt.s32.totalorder %s153_s12, %s153_s12 }
   0x7   :  { %258 = vmatprep.subr.bf16.mxu0 %v304_v1  ;;  %v160_v13 = vld [vmem:[%s381_s3] ss:$0 sm:$0xff]  ;;  %p281_p0 = scmp.ne.s32.totalorder %s153_s12, %s280_s2  ;;  %p286_p2 = scmp.lt.s32.totalorder %s280_s2, %s280_s2 }
   0x9   :  { %p287_p3 = por %p286_p2, %p285_p1 }
   0xa   :  { %260 = vmatpush3.bf16.msra.mxu0 %v194_v4 }
   0xb   :  { %261 = vmatprep.subr.bf16.mxu0 %v304_v1  ;;  %p288_p4 = pnand %p287_p3, %p281_p0 }
   0xe   :  { %263 = vmatpush3.bf16.msra.mxu0 %v195_v5 }
   0xf   :  { %264 = vmatprep.subr.bf16.mxu0 %v304_v1 }
  0x12   :  { %266 = vmatpush3.bf16.msra.mxu0 %v196_v6 }
  0x13   :  { %267 = vmatprep.subr.bf16.mxu0 %v304_v1 }
  0x16   :  { %269 = vmatpush3.bf16.msra.mxu0 %v197_v7 }
  0x17   :  { %270 = vmatprep.subr.bf16.mxu0 %v304_v1 }
  0x1a   :  { %272 = vmatpush3.bf16.msra.mxu0 %v198_v8 }
  0x1b   :  { %273 = vmatprep.subr.bf16.mxu0 %v304_v1 }
  0x1e   :  { %275 = vmatpush3.bf16.msra.mxu0 %v199_v9 }
  0x21   :  { %250 = vmatmul.mubr.f32.vlgmr.msra.gmra.mrb[0].mxu0 %v57_v10 }
  0xf4   :  { %v124_v12 = vpop.f32.mrb[0].mxu0 }
  0xf5   :  { %v136_v14 = vmul.f32 %v135_v11, %v124_v12  ;;  %v251_v15 = vpop.f32.mrb[1].mxu0 }
  0xf7   :  { %v144_v16 = vadd.f32 %v160_v13, %v136_v14 }
  0xf9   :  { %145 = vst [vmem:[#allocation4] sm:$0xff] %v144_v16 }
  0xfa   :  { %291 = shalt.err (!%p288_p4)
}
  0xfb   :  { %s292_s13 = scalar_lea.hbm %s382_s4, 128 }
  0xfc   :  { %p293_p5 = scmp.ne.s32.totalorder %s382_s4, %s292_s13  ;;  %p296_p6 = scmp.lt.u32.totalorder %s292_s13, %s382_s4 }
  0xfe   :  { %p298_p7 = pnand %p296_p6, %p293_p5 }
 0x100   :  { %301 = shalt.err (!%p298_p7)
}
 0x101   :  { %155 = dma.vmem_to_hbm [thread:$0]  %s153_s12, 128, %s382_s4, [#allocation5]  }
 0x102   :  { %302 = dma.done.wait [#allocation5], 128  }
 0x103   :  { %303 = vsyncadd [#allocation5], 4294967168 }
 0x104   :  { %159 = vsyncpa [#allocation5], 1 }

</bundles_post_ra>
